<compile_context>
chip_gen: v6e
topology: v6e:2x2x1
jax: 0.10.0
libtpu: 0.0.40
codegen_flags: <defaults>
</compile_context>

<pallas_src>
import functools

import jax
import jax.numpy as jnp
from jax import lax
from jax.experimental import pallas as pl
from jax.experimental.pallas import tpu as pltpu


def _drn_kernel(seed_ref, x_ref, *rest, p, eps, has_prev):
    if has_prev:
        prev_ref, g_ref, b_ref, o_ref = rest
    else:
        prev_ref = None
        g_ref, b_ref, o_ref = rest

    x = x_ref[...].astype(jnp.float32)
    rt, h_dim = x.shape

    if p > 0.0:
        # Counter-based hash RNG (murmur-style finalizer). Depends only on
        # (seed, global row index, column index): order independent across grid
        # steps and across calls with distinct seeds.
        row0 = (pl.program_id(0) * rt).astype(jnp.uint32)
        rows_u = lax.broadcasted_iota(jnp.int32, (rt, h_dim), 0).astype(jnp.uint32) + row0
        cols_u = lax.broadcasted_iota(jnp.int32, (rt, h_dim), 1).astype(jnp.uint32)
        seed_u = seed_ref[0].astype(jnp.uint32)

        h = rows_u * jnp.uint32(0x9E3779B1)
        h = h ^ (cols_u * jnp.uint32(0x85EBCA77))
        h = h + seed_u * jnp.uint32(0xC2B2AE3D)
        h = h ^ (h >> 16)
        h = h * jnp.uint32(0x7FEB352D)
        h = h ^ (h >> 15)
        h = h * jnp.uint32(0x846CA68B)
        h = h ^ (h >> 16)

        # 24-bit uniform compared against an integer threshold: keep prob = 1 - p.
        bits24 = (h >> 8).astype(jnp.int32)
        thresh = jnp.int32(int(round(p * float(1 << 24))))
        keep = bits24 >= thresh
        x = jnp.where(keep, x * jnp.float32(1.0 / (1.0 - p)), jnp.float32(0.0))

    if has_prev:
        x = x + prev_ref[...].astype(jnp.float32)

    # LayerNorm over the hidden (lane) axis — single pass statistics.
    inv_h = jnp.float32(1.0 / h_dim)
    s1 = jnp.sum(x, axis=-1, keepdims=True)
    s2 = jnp.sum(x * x, axis=-1, keepdims=True)
    mean = s1 * inv_h
    var = s2 * inv_h - mean * mean
    inv = lax.rsqrt(var + jnp.float32(eps))
    y = (x - mean) * inv * g_ref[...].astype(jnp.float32) + b_ref[...].astype(jnp.float32)
    o_ref[...] = y.astype(o_ref.dtype)


def drop_residual_normalize(out, prev_out, gamma, beta, *, p, eps=1e-5,
                            seed=0, training=True, row_tile=None,
                            vmem_budget_bytes=20 * 1024 * 1024):
    """out/prev_out: (B, S, H); gamma/beta: (H,). Returns (B, S, H)."""
    B, S, H = out.shape
    rows = B * S
    has_prev = prev_out is not None
    p_eff = float(p) if training else 0.0

    itemsize = jnp.dtype(out.dtype).itemsize
    align = {4: 8, 2: 16, 1: 32}.get(itemsize, 8)          # sublane packing
    n_streams = 3 if has_prev else 2                        # x, (prev), out

    rows_padded_min = pl.cdiv(rows, align) * align
    if row_tile is None:
        # Largest tile whose double-buffered working set fits the VMEM budget;
        # budget is conservative so it also fits v7x's 64 MiB physical VMEM.
        per_row_bytes = n_streams * 2 * H * itemsize
        rt = vmem_budget_bytes // max(per_row_bytes, 1)
        rt = max(align, min(int(rt), 2048, rows_padded_min))
    else:
        rt = max(align, min(int(row_tile), rows_padded_min))
    row_tile = max(align, (rt // align) * align)

    padded_rows = pl.cdiv(rows, row_tile) * row_tile
    pad = padded_rows - rows

    x2d = out.reshape(rows, H)
    if pad:
        x2d = jnp.pad(x2d, ((0, pad), (0, 0)))
    inputs = [x2d]
    if has_prev:
        prev2d = prev_out.reshape(rows, H)
        if pad:
            prev2d = jnp.pad(prev2d, ((0, pad), (0, 0)))
        inputs.append(prev2d)

    g2d = gamma.reshape(1, H).astype(jnp.float32)
    b2d = beta.reshape(1, H).astype(jnp.float32)
    seed_arr = jnp.array([seed], dtype=jnp.int32)

    kernel = functools.partial(_drn_kernel, p=p_eff, eps=float(eps), has_prev=has_prev)

    tile_spec = pl.BlockSpec((row_tile, H), lambda i, seed: (i, 0))
    param_spec = pl.BlockSpec((1, H), lambda i, seed: (0, 0))
    in_specs = [tile_spec] + ([tile_spec] if has_prev else []) + [param_spec, param_spec]

    grid = (padded_rows // row_tile,)

    bytes_accessed = n_streams * padded_rows * H * itemsize + 2 * H * 4 + 4
    cost = pl.CostEstimate(
        flops=10 * padded_rows * H,
        transcendentals=padded_rows,            # one rsqrt per row
        bytes_accessed=bytes_accessed,
    )

    y2d = pl.pallas_call(
        kernel,
        out_shape=jax.ShapeDtypeStruct((padded_rows, H), out.dtype),
        grid_spec=pltpu.PrefetchScalarGridSpec(
            num_scalar_prefetch=1,
            grid=grid,
            in_specs=in_specs,
            out_specs=pl.BlockSpec((row_tile, H), lambda i, seed: (i, 0)),
        ),
        compiler_params=pltpu.CompilerParams(
            # Hash RNG is order-independent -> rows can be sharded across TCs (v7x).
            dimension_semantics=("parallel",),
            # v5e scoped default is 16 MiB; 48 MiB is safe on all generations
            # (<= physical VMEM on v7x, well under v5e/v6e's 128 MiB).
            vmem_limit_bytes=48 * 1024 * 1024,
        ),
        cost_estimate=cost,
    )(seed_arr, *inputs, g2d, b2d)

    if pad:
        y2d = y2d[:rows]
    return y2d.reshape(B, S, H)


def _layernorm_ref(x, gamma, beta, eps=1e-5):
    mean = jnp.mean(x, axis=-1, keepdims=True)
    var = jnp.mean((x - mean) ** 2, axis=-1, keepdims=True)
    return (x - mean) * lax.rsqrt(var + eps) * gamma + beta


if __name__ == "__main__":
    # Small shapes consistent with the module: (batch=2, seq=8, hidden=32).
    B, S, H = 2, 8, 32
    attention_dropout = 0.1

    key = jax.random.PRNGKey(0)
    k1, k2 = jax.random.split(key)
    out = jax.random.normal(k1, (B, S, H), dtype=jnp.float32)
    prev_out = jax.random.normal(k2, (B, S, H), dtype=jnp.float32)

    # nn.LayerNorm default init: weight=1, bias=0.
    gamma = jnp.ones((H,), dtype=jnp.float32)
    beta = jnp.zeros((H,), dtype=jnp.float32)

    # Training mode (dropout active) — just needs to run cleanly.
    y_train = drop_residual_normalize(out, prev_out, gamma, beta,
                                      p=attention_dropout, training=True, seed=1234)
    jax.block_until_ready(y_train)
    assert y_train.shape == (B, S, H)
    assert bool(jnp.all(jnp.isfinite(y_train)))

    # Eval mode with residual: must match the pure-JAX reference exactly (no dropout).
    y_eval = drop_residual_normalize(out, prev_out, gamma, beta,
                                     p=attention_dropout, training=False)
    jax.block_until_ready(y_eval)
    ref = _layernorm_ref(out + prev_out, gamma, beta)
    assert jnp.allclose(y_eval, ref, atol=1e-5, rtol=1e-5), "LayerNorm+residual mismatch"

    # Eval mode without residual: exercises the no-prev variant (no zero stream).
    y_noprev = drop_residual_normalize(out, None, gamma, beta,
                                       p=attention_dropout, training=False)
    jax.block_until_ready(y_noprev)
    ref_np = _layernorm_ref(out, gamma, beta)
    assert jnp.allclose(y_noprev, ref_np, atol=1e-5, rtol=1e-5), "LayerNorm (no prev) mismatch"

    print("KERNEL_OK")
</pallas_src>

<mosaic_0001>
module attributes {stable_mosaic.version = 11 : i64} {
  func.func @_drn_kernel(%arg0: i32, %arg1: memref<1xi32, #tpu.memory_space<smem>>, %arg2: memref<16x32xf32, #tpu.memory_space<vmem>>, %arg3: memref<16x32xf32, #tpu.memory_space<vmem>>, %arg4: memref<1x32xf32, #tpu.memory_space<vmem>>, %arg5: memref<1x32xf32, #tpu.memory_space<vmem>>, %arg6: memref<16x32xf32, #tpu.memory_space<vmem>>) attributes {dimension_semantics = [#tpu.dimension_semantics<parallel>], iteration_bounds = array<i64: 1>, scalar_prefetch = 1 : i64, scratch_operands = 0 : i64, tpu.core_type = #tpu.core_type<tc>, window_params = [{transform_indices = @transform_0, window_bounds = array<i64: 16, 32>}, {transform_indices = @transform_1, window_bounds = array<i64: 16, 32>}, {pipeline_mode = #tpu.pipeline_mode<synchronous>, transform_indices = @transform_2, window_bounds = array<i64: 1, 32>}, {pipeline_mode = #tpu.pipeline_mode<synchronous>, transform_indices = @transform_3, window_bounds = array<i64: 1, 32>}, {transform_indices = @transform_4, window_bounds = array<i64: 16, 32>}]} {
    %c0 = arith.constant 0 : index
    %c0_0 = arith.constant 0 : index
    %0 = vector.load %arg2[%c0, %c0_0] : memref<16x32xf32, #tpu.memory_space<vmem>>, vector<16x32xf32>
    %c16_i32 = arith.constant 16 : i32
    %1 = arith.muli %arg0, %c16_i32 : i32
    %2 = tpu.iota {dimensions = array<i32: 0>} : vector<16x32xi32>
    %3 = vector.broadcast %1 : i32 to vector<16x32xi32>
    %4 = arith.addi %2, %3 : vector<16x32xi32>
    %5 = tpu.iota {dimensions = array<i32: 1>} : vector<16x32xi32>
    %c0_1 = arith.constant 0 : index
    %6 = memref.load %arg1[%c0_1] : memref<1xi32, #tpu.memory_space<smem>>
    %c-1640531535_i32 = arith.constant -1640531535 : i32
    %7 = vector.broadcast %c-1640531535_i32 : i32 to vector<16x32xi32>
    %8 = arith.muli %4, %7 : vector<16x32xi32>
    %c-2048144777_i32 = arith.constant -2048144777 : i32
    %9 = vector.broadcast %c-2048144777_i32 : i32 to vector<16x32xi32>
    %10 = arith.muli %5, %9 : vector<16x32xi32>
    %11 = arith.xori %8, %10 : vector<16x32xi32>
    %c-1028477379_i32 = arith.constant -1028477379 : i32
    %12 = arith.muli %6, %c-1028477379_i32 : i32
    %13 = vector.broadcast %12 : i32 to vector<16x32xi32>
    %14 = arith.addi %11, %13 : vector<16x32xi32>
    %c16_i32_2 = arith.constant 16 : i32
    %15 = vector.broadcast %c16_i32_2 : i32 to vector<16x32xi32>
    %16 = arith.shrui %14, %15 : vector<16x32xi32>
    %17 = arith.xori %14, %16 : vector<16x32xi32>
    %c2146121005_i32 = arith.constant 2146121005 : i32
    %18 = vector.broadcast %c2146121005_i32 : i32 to vector<16x32xi32>
    %19 = arith.muli %17, %18 : vector<16x32xi32>
    %c15_i32 = arith.constant 15 : i32
    %20 = vector.broadcast %c15_i32 : i32 to vector<16x32xi32>
    %21 = arith.shrui %19, %20 : vector<16x32xi32>
    %22 = arith.xori %19, %21 : vector<16x32xi32>
    %c-2073254261_i32 = arith.constant -2073254261 : i32
    %23 = vector.broadcast %c-2073254261_i32 : i32 to vector<16x32xi32>
    %24 = arith.muli %22, %23 : vector<16x32xi32>
    %c16_i32_3 = arith.constant 16 : i32
    %25 = vector.broadcast %c16_i32_3 : i32 to vector<16x32xi32>
    %26 = arith.shrui %24, %25 : vector<16x32xi32>
    %27 = arith.xori %24, %26 : vector<16x32xi32>
    %c8_i32 = arith.constant 8 : i32
    %28 = vector.broadcast %c8_i32 : i32 to vector<16x32xi32>
    %29 = arith.shrui %27, %28 : vector<16x32xi32>
    %c1677722_i32 = arith.constant 1677722 : i32
    %30 = vector.broadcast %c1677722_i32 : i32 to vector<16x32xi32>
    %31 = arith.cmpi sge, %29, %30 : vector<16x32xi32>
    %cst = arith.constant 1.11111116 : f32
    %32 = vector.broadcast %cst : f32 to vector<16x32xf32>
    %33 = arith.mulf %0, %32 : vector<16x32xf32>
    %cst_4 = arith.constant 0.000000e+00 : f32
    %34 = vector.broadcast %cst_4 : f32 to vector<16x32xf32>
    %35 = arith.select %31, %33, %34 : vector<16x32xi1>, vector<16x32xf32>
    %c0_5 = arith.constant 0 : index
    %c0_6 = arith.constant 0 : index
    %36 = vector.load %arg3[%c0_5, %c0_6] : memref<16x32xf32, #tpu.memory_space<vmem>>, vector<16x32xf32>
    %37 = arith.addf %35, %36 : vector<16x32xf32>
    %cst_7 = arith.constant dense<0.000000e+00> : vector<16xf32>
    %38 = vector.multi_reduction <add>, %37, %cst_7 [1] : vector<16x32xf32> to vector<16xf32>
    %39 = vector.shape_cast %38 : vector<16xf32> to vector<16x1xf32>
    %40 = arith.mulf %37, %37 : vector<16x32xf32>
    %cst_8 = arith.constant dense<0.000000e+00> : vector<16xf32>
    %41 = vector.multi_reduction <add>, %40, %cst_8 [1] : vector<16x32xf32> to vector<16xf32>
    %42 = vector.shape_cast %41 : vector<16xf32> to vector<16x1xf32>
    %cst_9 = arith.constant 3.125000e-02 : f32
    %43 = vector.broadcast %cst_9 : f32 to vector<16x1xf32>
    %44 = arith.mulf %39, %43 : vector<16x1xf32>
    %cst_10 = arith.constant 3.125000e-02 : f32
    %45 = vector.broadcast %cst_10 : f32 to vector<16x1xf32>
    %46 = arith.mulf %42, %45 : vector<16x1xf32>
    %47 = arith.mulf %44, %44 : vector<16x1xf32>
    %48 = arith.subf %46, %47 : vector<16x1xf32>
    %cst_11 = arith.constant 9.99999974E-6 : f32
    %49 = vector.broadcast %cst_11 : f32 to vector<16x1xf32>
    %50 = arith.addf %48, %49 : vector<16x1xf32>
    %51 = math.rsqrt %50 : vector<16x1xf32>
    %52 = vector.broadcast %44 : vector<16x1xf32> to vector<16x32xf32>
    %53 = arith.subf %37, %52 : vector<16x32xf32>
    %54 = vector.broadcast %51 : vector<16x1xf32> to vector<16x32xf32>
    %55 = arith.mulf %53, %54 : vector<16x32xf32>
    %c0_12 = arith.constant 0 : index
    %c0_13 = arith.constant 0 : index
    %56 = vector.load %arg4[%c0_12, %c0_13] : memref<1x32xf32, #tpu.memory_space<vmem>>, vector<1x32xf32>
    %57 = vector.broadcast %56 : vector<1x32xf32> to vector<16x32xf32>
    %58 = arith.mulf %55, %57 : vector<16x32xf32>
    %c0_14 = arith.constant 0 : index
    %c0_15 = arith.constant 0 : index
    %59 = vector.load %arg5[%c0_14, %c0_15] : memref<1x32xf32, #tpu.memory_space<vmem>>, vector<1x32xf32>
    %60 = vector.broadcast %59 : vector<1x32xf32> to vector<16x32xf32>
    %61 = arith.addf %58, %60 : vector<16x32xf32>
    %c0_16 = arith.constant 0 : index
    %c0_17 = arith.constant 0 : index
    %62 = vector.load %arg6[%c0_16, %c0_17] : memref<16x32xf32, #tpu.memory_space<vmem>>, vector<16x32xf32>
    tpu.vector_store %arg6[%c0_16, %c0_17], %61 {strides = array<i32>} : memref<16x32xf32, #tpu.memory_space<vmem>>, vector<16x32xf32>,
    return
  }
  func.func @transform_0(%arg0: i32, %arg1: memref<1xi32, #tpu.memory_space<smem>>) -> (i32, i32) {
    %c0_i32 = arith.constant 0 : i32
    %c0_i32_0 = arith.constant 0 : i32
    return %arg0, %c0_i32 : i32, i32
  }
  func.func @transform_1(%arg0: i32, %arg1: memref<1xi32, #tpu.memory_space<smem>>) -> (i32, i32) {
    %c0_i32 = arith.constant 0 : i32
    %c0_i32_0 = arith.constant 0 : i32
    return %arg0, %c0_i32 : i32, i32
  }
  func.func @transform_2(%arg0: i32, %arg1: memref<1xi32, #tpu.memory_space<smem>>) -> (i32, i32) {
    %c0_i32 = arith.constant 0 : i32
    %c0_i32_0 = arith.constant 0 : i32
    %c0_i32_1 = arith.constant 0 : i32
    return %c0_i32, %c0_i32_0 : i32, i32
  }
  func.func @transform_3(%arg0: i32, %arg1: memref<1xi32, #tpu.memory_space<smem>>) -> (i32, i32) {
    %c0_i32 = arith.constant 0 : i32
    %c0_i32_0 = arith.constant 0 : i32
    %c0_i32_1 = arith.constant 0 : i32
    return %c0_i32, %c0_i32_0 : i32, i32
  }
  func.func @transform_4(%arg0: i32, %arg1: memref<1xi32, #tpu.memory_space<smem>>) -> (i32, i32) {
    %c0_i32 = arith.constant 0 : i32
    %c0_i32_0 = arith.constant 0 : i32
    return %arg0, %c0_i32 : i32, i32
  }
}

</mosaic_0001>

<bundles_post_ra>
// kernel: tpu_custom_call.1
= control target key start
LH: loop header
LB: loop body
LE: loop exit
PB: predicated region body
PF: predicated region fallthrough
CT: control target
= control target key end

     0   :  { %11 = vsyncpa [#allocation5], 0  ;;  %s311_s0 = inlined_call_operand.<no memory space> [shape: s32[1], index: 0, kind: input, shape index: {}]   ;;  %s312_s1 = inlined_call_operand.hbm [shape: f32[16,32], index: 1, kind: input, shape index: {}]   ;;  %s313_s2 = inlined_call_operand.hbm [shape: f32[16,32], index: 2, kind: input, shape index: {}]   ;;  %s314_s3 = inlined_call_operand.vmem [shape: f32[1,32], index: 3, kind: input, shape index: {}]   ;;  %s315_s4 = inlined_call_operand.vmem [shape: f32[1,32], index: 4, kind: input, shape index: {}]   ;;  %s316_s5 = inlined_call_operand.hbm [shape: f32[16,32], index: 5, kind: output, shape index: {}]  }
   0x1   :  { %12 = vsyncpa [#allocation8], 0 }
   0x2   :  { %13 = vsyncpa [#allocation6], 0  ;;  %s243_s18 = smov [#allocation4]  }
   0x3   :  { %s19_s19 = sshll.u32 %s243_s18, 4  ;;  %s20_s19 = int_to_ptr.vmem [resolvable:$true] %s19_s19 }
   0x4   :  { %s185_s20 = scalar_lea.vmem %s20_s19, 256  ;;  %p190_p1 = scmp.lt.s32.totalorder %s20_s19, %s20_s19 }
   0x5   :  { %p186_p0 = scmp.ne.s32.totalorder %s20_s19, %s185_s20  ;;  %p191_p2 = scmp.lt.s32.totalorder %s185_s20, %s185_s20 }
   0x7   :  { %p192_p3 = por %p191_p2, %p190_p1 }
   0x9   :  { %p193_p4 = pnand %p192_p3, %p186_p0 }
   0xb   :  { %196 = shalt.err (!%p193_p4)
}
   0xc   :  { %s244_s21 = smov 128   ;;  %s245_s22 = smov 8  }
   0xd   :  { %25 = dma.hbm_to_vmem [thread:$0]  %s312_s1, 256, %s20_s19, [#allocation5], %s244_s21, %s244_s21, %s245_s22  }
   0xe   :  { %s246_s25 = smov [#allocation7]  }
   0xf   :  { %s31_s26 = sshll.u32 %s246_s25, 4  ;;  %s32_s26 = int_to_ptr.vmem [resolvable:$true] %s31_s26 }
  0x10   :  { %s205_s27 = scalar_lea.vmem %s32_s26, 256  ;;  %p210_p6 = scmp.lt.s32.totalorder %s32_s26, %s32_s26 }
  0x11   :  { %p206_p5 = scmp.ne.s32.totalorder %s32_s26, %s205_s27  ;;  %p211_p7 = scmp.lt.s32.totalorder %s205_s27, %s205_s27 }
  0x13   :  { %p212_p8 = por %p211_p7, %p210_p6 }
  0x15   :  { %p213_p9 = pnand %p212_p8, %p206_p5 }
  0x17   :  { %216 = shalt.err (!%p213_p9)
}
  0x18   :  { %37 = dma.hbm_to_vmem [thread:$0]  %s313_s2, 256, %s32_s26, [#allocation8], %s244_s21, %s244_s21, %s245_s22  }
  0x19   :  { %237 = dma.done.wait [#allocation5], 256  }
  0x1a   :  { %238 = vsyncadd [#allocation5], 4294967040 }
  0x1b   :  { %239 = dma.done.wait [#allocation8], 256  }
  0x1c   :  { %240 = vsyncadd [#allocation8], 4294967040  ;;  %v51_v0 = vlaneseq  ;;  %s65_s6 = smul.u32 3266489917, %s311_s0  ;;  %v48_v23 = vld [vmem:[#allocation4] sm:$0xff]  ;;  %v49_v27 = vld [vmem:[#allocation4 + $0x8] sm:$0xff] }
  0x1d   :  { %v89_v29 = vmul.f32 1.1111112, %v48_v23  ;;  %v93_v32 = vld [vmem:[#allocation7] sm:$0xff]  ;;  %v90_v33 = vmul.f32 1.1111112, %v49_v27  ;;  %vm97_vm1 = vcmask 261120  }
  0x1e   :  { %v52_v1 = vshrl.u32 %v51_v0, 7  ;;  %v58_v2 = vand.u32 127, %v51_v0  ;;  %v66_v6 = vstv %s65_s6  ;;  %v94_v36 = vld [vmem:[#allocation7 + $0x8] sm:$0xff]  ;;  %v166_v62 = vld [vmem:[%s314_s3] ss:$0 sm:$0xff]  ;;  %s247_s9 = smov [#allocation9]  }
  0x1f   :  { %v167_v0 = vld [vmem:[%s315_s4] ss:$0 sm:$0xff]  ;;  %s153_s10 = sshll.u32 %s247_s9, 4  ;;  %s154_s10 = int_to_ptr.vmem [resolvable:$true] %s153_s10 }
  0x20   :  { %v60_v3 = vmul.u32 2654435761, %v52_v1  ;;  %v62_v4 = vmul.u32 2246822519, %v58_v2  ;;  %v53_v5 = vadd.s32 8, %v52_v1  ;;  %s217_s3 = scalar_lea.vmem %s154_s10, 256  ;;  %p222_p11 = scmp.lt.s32.totalorder %s154_s10, %s154_s10 }
  0x21   :  { %p218_p10 = scmp.ne.s32.totalorder %s154_s10, %s217_s3  ;;  %p223_p12 = scmp.lt.s32.totalorder %s217_s3, %s217_s3 }
  0x22   :  { %v63_v7 = vxor.u32 %v62_v4, %v60_v3  ;;  %v61_v8 = vmul.u32 2654435761, %v53_v5 }
  0x23   :  { %p224_p13 = por %p223_p12, %p222_p11 }
  0x24   :  { %v67_v9 = vadd.s32 %v66_v6, %v63_v7  ;;  %v64_v10 = vxor.u32 %v62_v4, %v61_v8 }
  0x25   :  { %p225_p0 = pnand %p224_p13, %p218_p10 }
  0x26   :  { %v69_v11 = vshrl.u32 %v67_v9, 16  ;;  %v68_v12 = vadd.s32 %v66_v6, %v64_v10 }
  0x28   :  { %v71_v13 = vxor.u32 %v69_v11, %v67_v9  ;;  %v70_v14 = vshrl.u32 %v68_v12, 16 }
  0x2a   :  { %v73_v15 = vmul.u32 2146121005, %v71_v13  ;;  %v72_v16 = vxor.u32 %v70_v14, %v68_v12 }
  0x2c   :  { %v75_v17 = vshrl.u32 %v73_v15, 15  ;;  %v74_v18 = vmul.u32 2146121005, %v72_v16 }
  0x2e   :  { %v77_v19 = vxor.u32 %v75_v17, %v73_v15  ;;  %v76_v20 = vshrl.u32 %v74_v18, 15 }
  0x30   :  { %v79_v21 = vmul.u32 2221713035, %v77_v19  ;;  %v78_v22 = vxor.u32 %v76_v20, %v74_v18 }
  0x32   :  { %v81_v24 = vshrl.u32 %v79_v21, 16  ;;  %v80_v25 = vmul.u32 2221713035, %v78_v22 }
  0x34   :  { %v83_v26 = vxor.u32 %v81_v24, %v79_v21  ;;  %v82_v28 = vshrl.u32 %v80_v25, 16 }
  0x36   :  { %v85_v30 = vshrl.u32 %v83_v26, 8  ;;  %v84_v31 = vxor.u32 %v82_v28, %v80_v25 }
  0x38   :  { %vm87_vm0 = vcmp.ge.s32.totalorder %v85_v30, 1677722  ;;  %v86_v34 = vshrl.u32 %v84_v31, 8 }
  0x39   :  { %v91_v35 = vsel %vm87_vm0, %v89_v29, 0.0 }
  0x3a   :  { %v95_v37 = vadd.f32 %v93_v32, %v91_v35  ;;  %vm88_vm2 = vcmp.ge.s32.totalorder %v86_v34, 1677722 }
  0x3b   :  { %v92_v38 = vsel %vm88_vm2, %v90_v33, 0.0 }
  0x3c   :  { %v98_v39 = vsel %vm97_vm1, %v95_v37, 0.0  ;;  %v104_v40 = vmul.f32 %v95_v37, %v95_v37  ;;  %v96_v41 = vadd.f32 %v94_v36, %v92_v38 }
  0x3d   :  { %99 = vadd.xlane.f32.xlu0 %v98_v39 }
  0x3e   :  { %v106_v42 = vsel %vm97_vm1, %v104_v40, 0.0  ;;  %v101_v43 = vsel %vm97_vm1, %v96_v41, 0.0  ;;  %v105_v44 = vmul.f32 %v96_v41, %v96_v41 }
  0x3f   :  { %107 = vadd.xlane.f32.xlu1 %v106_v42 }
  0x40   :  { %v109_v45 = vsel %vm97_vm1, %v105_v44, 0.0 }
  0x41   :  { %102 = vadd.xlane.f32.xlu0 %v101_v43 }
  0x43   :  { %110 = vadd.xlane.f32.xlu1 %v109_v45 }
  0xc6   :  { %v100_v46 = vpop.xlane.xlu0 %99 }
  0xc7   :  { %v112_v47 = vmul.f32 0.03125, %v100_v46 }
  0xc8   :  { %v108_v48 = vpop.xlane.xlu1 %107 }
  0xc9   :  { %v116_v49 = vmul.f32 %v112_v47, %v112_v47  ;;  %v114_v50 = vmul.f32 0.03125, %v108_v48  ;;  %v124_v60 = vsub.f32 %v95_v37, %v112_v47 }
  0xca   :  { %v103_v51 = vpop.xlane.xlu0 %102 }
  0xcb   :  { %v118_v52 = vsub.f32 %v114_v50, %v116_v49  ;;  %v113_v53 = vmul.f32 0.03125, %v103_v51 }
  0xcc   :  { %v111_v54 = vpop.xlane.xlu1 %110 }
  0xcd   :  { %v120_v55 = vadd.f32 1e-05, %v118_v52  ;;  %v117_v56 = vmul.f32 %v113_v53, %v113_v53  ;;  %v115_v57 = vmul.f32 0.03125, %v111_v54  ;;  %v125_v1 = vsub.f32 %v96_v41, %v113_v53 }
  0xcf   :  { %173 = vrsqrt.f32 %v120_v55  ;;  %v119_v58 = vsub.f32 %v115_v57, %v117_v56 }
  0xd1   :  { %v121_v59 = vadd.f32 1e-05, %v119_v58 }
  0xd3   :  { %175 = vrsqrt.f32 %v121_v59 }
  0xdc   :  { %v174_v61 = vpop.eup %173 }
  0xdd   :  { %v126_v63 = vmul.f32 %v174_v61, %v124_v60 }
  0xdf   :  { %v135_v2 = vmul.f32 %v166_v62, %v126_v63 }
  0xe0   :  { %v176_v3 = vpop.eup %175 }
  0xe1   :  { %v127_v4 = vmul.f32 %v176_v3, %v125_v1  ;;  %v144_v5 = vadd.f32 %v167_v0, %v135_v2 }
  0xe3   :  { %v136_v6 = vmul.f32 %v166_v62, %v127_v4  ;;  %146 = vst.msk [vmem:[#allocation9] sm:$0xff] %vm97_vm1, %v144_v5 }
  0xe5   :  { %v145_v7 = vadd.f32 %v167_v0, %v136_v6 }
  0xe7   :  { %147 = vst.msk [vmem:[#allocation9 + $0x8] sm:$0xff] %vm97_vm1, %v145_v7 }
  0xe8   :  { %228 = shalt.err (!%p225_p0)
}
  0xe9   :  { %159 = dma.vmem_to_hbm [thread:$0]  %s154_s10, 256, %s316_s5, [#allocation6], %s244_s21, %s244_s21, %s245_s22  }
  0xea   :  { %241 = dma.done.wait [#allocation6], 256  }
  0xeb   :  { %242 = vsyncadd [#allocation6], 4294967040 }
  0xec   :  { %163 = vsyncpa [#allocation5], 1 }
  0xed   :  { %164 = vsyncpa [#allocation8], 1 }
  0xee   :  { %165 = vsyncpa [#allocation6], 1 }

</bundles_post_ra>
